<compile_context>
chip_gen: v5e
topology: v5e:2x2
jax: 0.10.0
libtpu: 0.0.40
codegen_flags: <defaults>
</compile_context>

<pallas_src>
import math
from functools import partial

import jax
import jax.numpy as jnp
from jax import lax
from jax.experimental import pallas as pl
from jax.experimental.pallas import tpu as pltpu


def _round_up(x, m):
    return ((x + m - 1) // m) * m


def _pick_tile(dim, pref, align):
    """Largest t <= pref with dim % t == 0 and t % align == 0.
    Falls back to the full dim when dim <= pref or dim is not align-aligned."""
    if dim <= pref:
        return dim
    if dim % align:
        return dim                       # irregular: one full-extent block
    t = max(pref // align, 1) * align
    while t >= align:
        if dim % t == 0:
            return t
        t -= align
    return dim


def _vmem_need(tm, tn, tk, in_sz, w_sz, out_sz):
    return (2 * tm * tk * in_sz          # x block (double buffered)
            + 2 * 2 * tk * tn * w_sz     # val + gate weight blocks (double buffered)
            + 2 * 2 * tn * 4             # bias blocks
            + 2 * tm * tn * out_sz       # output block (double buffered)
            + 2 * tm * tn * 4)           # two f32 accumulator scratches


def _vmem_cap_bytes():
    try:
        return int(pltpu.get_tpu_info().vmem_capacity_bytes * 0.85)
    except Exception:
        return 48 * 1024 * 1024          # safe on v7x (64 MiB) as well as v5e/v6e


def _geglu_kernel(x_ref, wv_ref, wg_ref, bv_ref, bg_ref, o_ref,
                  accv_ref, accg_ref, *, approximate):
    k = pl.program_id(2)

    @pl.when(k == 0)
    def _():
        accv_ref[...] = jnp.zeros_like(accv_ref)
        accg_ref[...] = jnp.zeros_like(accg_ref)

    x = x_ref[...]
    if x.dtype != wv_ref.dtype:
        # In-kernel cast to the matmul operand dtype (no separate XLA pass over x).
        x = x.astype(wv_ref.dtype)

    accv_ref[...] += jnp.dot(x, wv_ref[...], preferred_element_type=jnp.float32)
    accg_ref[...] += jnp.dot(x, wg_ref[...], preferred_element_type=jnp.float32)

    @pl.when(k == pl.num_programs(2) - 1)
    def _():
        val = accv_ref[...] + bv_ref[...].astype(jnp.float32)
        gate = accg_ref[...] + bg_ref[...].astype(jnp.float32)
        if approximate:
            c = math.sqrt(2.0 / math.pi)
            gelu = 0.5 * gate * (1.0 + jnp.tanh(c * (gate + 0.044715 * gate * gate * gate)))
        else:
            # exact (erf-based) GELU matches torch.nn.functional.gelu default
            gelu = 0.5 * gate * (1.0 + lax.erf(gate * (1.0 / math.sqrt(2.0))))
        o_ref[...] = (val * gelu).astype(o_ref.dtype)


def geglu(x, weight, bias, *, tm=512, tn=1024, tk=2048,
          compute_dtype=None, approximate=False):
    """GEGLU forward.

    x:      (..., dim_in)
    weight: (dim_in, 2*dim_out)   (transposed vs torch nn.Linear's (out, in))
    bias:   (2*dim_out,)
    compute_dtype: optional matmul operand dtype (e.g. jnp.bfloat16 on v6e/v7x);
                   accumulation, bias add and GELU stay float32.  In real use,
                   persist the cast weights outside the hot path.
    approximate:   tanh-approx GELU (EUP-friendly) instead of exact erf.
    """
    dim_in, two_dim_out = weight.shape
    assert two_dim_out % 2 == 0
    dim_out = two_dim_out // 2
    assert bias.shape == (two_dim_out,)
    assert x.shape[-1] == dim_in
    lead = x.shape[:-1]
    out_dtype = x.dtype

    if compute_dtype is not None and weight.dtype != compute_dtype:
        weight = weight.astype(compute_dtype)   # hoist/persist outside hot path in real use

    x2d = x.reshape(-1, dim_in)
    M = x2d.shape[0]

    in_sz = jnp.dtype(x2d.dtype).itemsize
    w_sz = jnp.dtype(weight.dtype).itemsize
    out_sz = jnp.dtype(out_dtype).itemsize

    # --- value / gate operands (zero-copy when dim_out is lane-aligned) -------
    if dim_out % 128 == 0:
        tn_eff = _pick_tile(dim_out, tn, 128)        # multiple of 128, divides dim_out
        w_val = w_gate = weight                       # same fused array, offset index_map
        b2d = bias.reshape(1, two_dim_out)
        b_val = b_gate = b2d
        noff = dim_out // tn_eff                      # gate half's N-block offset
    else:
        # Small / irregular dim_out: full-extent N blocks on explicit halves.
        tn_eff = dim_out
        w_val, w_gate = weight[:, :dim_out], weight[:, dim_out:]
        b_val = bias[:dim_out].reshape(1, dim_out)
        b_gate = bias[dim_out:].reshape(1, dim_out)
        noff = 0
    grid_n = dim_out // tn_eff

    # --- row (M) tiling: pad only to the sublane multiple (8); the ragged tail
    # block (if any) is masked by Pallas instead of padding all of x to tm. ------
    m_pad = _round_up(max(M, 1), 8)
    if m_pad != M:
        x2d = jnp.pad(x2d, ((0, m_pad - M), (0, 0)))  # at most 7 rows
    tm_eff = min(_round_up(tm, 8), m_pad)
    grid_m = pl.cdiv(m_pad, tm_eff)

    # --- K (dim_in) tiling, auto-shrunk to the VMEM budget ---------------------
    vmem_cap = _vmem_cap_bytes()
    tk_eff = _pick_tile(dim_in, tk, 128)
    while (_vmem_need(tm_eff, tn_eff, tk_eff, in_sz, w_sz, out_sz) > vmem_cap
           and tk_eff > 128 and dim_in % 128 == 0):
        smaller = _pick_tile(dim_in, max(tk_eff // 2, 128), 128)
        if smaller >= tk_eff:
            break
        tk_eff = smaller
    grid_k = dim_in // tk_eff

    # --- adaptive grid order ----------------------------------------------------
    x_bytes = m_pad * dim_in * in_sz
    w_bytes = dim_in * two_dim_out * w_sz
    if grid_k == 1:
        # n-outer (weight-stationary) re-streams x grid_n times; m-outer re-streams
        # the weights grid_m times.  Pick the cheaper direction.
        n_outer = (grid_n * x_bytes + w_bytes) <= (x_bytes + grid_m * w_bytes)
    else:
        n_outer = True   # with a tiled K axis both operands restream; order is neutral

    if n_outer:
        grid = (grid_n, grid_m, grid_k)
        _m = lambda a, b: b
        _n = lambda a, b: a
    else:
        grid = (grid_m, grid_n, grid_k)
        _m = lambda a, b: a
        _n = lambda a, b: b

    need = _vmem_need(tm_eff, tn_eff, tk_eff, in_sz, w_sz, out_sz)
    vmem_limit = int(min(vmem_cap, max(int(need * 1.25) + (2 << 20), 32 << 20)))

    x_reads = grid_n if (grid_k > 1 or n_outer) else 1
    w_reads = grid_m if (grid_k > 1 or not n_outer) else 1
    cost = pl.CostEstimate(
        flops=2 * m_pad * dim_in * two_dim_out,
        transcendentals=m_pad * dim_out,
        bytes_accessed=(x_reads * x_bytes + w_reads * w_bytes
                        + two_dim_out * 4 + m_pad * dim_out * out_sz),
    )

    out = pl.pallas_call(
        partial(_geglu_kernel, approximate=approximate),
        out_shape=jax.ShapeDtypeStruct((m_pad, dim_out), out_dtype),
        grid_spec=pltpu.PrefetchScalarGridSpec(
            num_scalar_prefetch=0,
            grid=grid,
            in_specs=[
                pl.BlockSpec((tm_eff, tk_eff), lambda a, b, k: (_m(a, b), k)),
                pl.BlockSpec((tk_eff, tn_eff), lambda a, b, k: (k, _n(a, b))),
                pl.BlockSpec((tk_eff, tn_eff), lambda a, b, k: (k, _n(a, b) + noff)),
                pl.BlockSpec((1, tn_eff), lambda a, b, k: (0, _n(a, b))),
                pl.BlockSpec((1, tn_eff), lambda a, b, k: (0, _n(a, b) + noff)),
            ],
            out_specs=pl.BlockSpec((tm_eff, tn_eff),
                                   lambda a, b, k: (_m(a, b), _n(a, b))),
            scratch_shapes=[pltpu.VMEM((tm_eff, tn_eff), jnp.float32),
                            pltpu.VMEM((tm_eff, tn_eff), jnp.float32)],
        ),
        compiler_params=pltpu.CompilerParams(
            dimension_semantics=("parallel", "parallel", "arbitrary"),
            vmem_limit_bytes=vmem_limit,
        ),
        cost_estimate=cost,
    )(x2d, w_val, w_gate, b_val, b_gate)

    if m_pad != M:
        out = out[:M]
    return out.reshape(*lead, dim_out)


def _geglu_ref(x, weight, bias):
    dim_out = weight.shape[1] // 2
    proj = x @ weight + bias
    val, gate = proj[..., :dim_out], proj[..., dim_out:]
    return val * (0.5 * gate * (1.0 + lax.erf(gate / jnp.sqrt(2.0))))


if __name__ == "__main__":
    key = jax.random.PRNGKey(0)
    kx, kw, kb = jax.random.split(key, 3)

    # --- 1) small shapes consistent with the module: (batch, seq, dim_in) -----
    batch, seq, dim_in, dim_out = 2, 8, 32, 32
    bound = 1.0 / math.sqrt(dim_in)
    x = jax.random.normal(kx, (batch, seq, dim_in), dtype=jnp.float32)
    w = jax.random.uniform(kw, (dim_in, 2 * dim_out), jnp.float32, -bound, bound)
    b = jax.random.uniform(kb, (2 * dim_out,), jnp.float32, -bound, bound)

    out = jax.block_until_ready(geglu(x, w, b))
    ref = _geglu_ref(x, w, b)
    assert out.shape == (batch, seq, dim_out)
    assert jnp.allclose(out, ref, atol=1e-5, rtol=1e-5)

    # --- 2) ragged rows (M=21) + non-128-multiple dim_out (half-slice fallback,
    #        masked tail block, multi-row-tile grid) ----------------------------
    b2_, s2_, di2, do2 = 3, 7, 64, 48
    bound2 = 1.0 / math.sqrt(di2)
    x2 = jax.random.normal(kx, (b2_, s2_, di2), dtype=jnp.float32)
    w2 = jax.random.uniform(kw, (di2, 2 * do2), jnp.float32, -bound2, bound2)
    bb2 = jax.random.uniform(kb, (2 * do2,), jnp.float32, -bound2, bound2)
    out2 = jax.block_until_ready(geglu(x2, w2, bb2, tm=16))
    ref2 = _geglu_ref(x2, w2, bb2)
    assert out2.shape == (b2_, s2_, do2)
    assert jnp.allclose(out2, ref2, atol=1e-5, rtol=1e-5)

    # --- 3) bf16 operands + K-tiled accumulation (zero-copy fused weight views) -
    b3_, s3_, di3, do3 = 2, 64, 256, 128
    bound3 = 1.0 / math.sqrt(di3)
    x3 = jax.random.normal(kx, (b3_, s3_, di3), dtype=jnp.float32)
    w3 = jax.random.uniform(kw, (di3, 2 * do3), jnp.float32, -bound3, bound3)
    b3 = jax.random.uniform(kb, (2 * do3,), jnp.float32, -bound3, bound3)
    out3 = jax.block_until_ready(geglu(x3, w3, b3, tk=128, compute_dtype=jnp.bfloat16))
    ref3 = _geglu_ref(x3, w3, b3)
    assert out3.shape == (b3_, s3_, do3)
    assert jnp.allclose(out3, ref3, atol=5e-2, rtol=5e-2)

    # --- 4) tanh-approximate GELU option ---------------------------------------
    out4 = jax.block_until_ready(geglu(x, w, b, approximate=True))
    proj = x @ w + b
    v4, g4 = proj[..., :dim_out], proj[..., dim_out:]
    ref4 = v4 * (0.5 * g4 * (1.0 + jnp.tanh(math.sqrt(2.0 / math.pi)
                                            * (g4 + 0.044715 * g4 ** 3))))
    assert jnp.allclose(out4, ref4, atol=1e-4, rtol=1e-4)

    print("KERNEL_OK")
</pallas_src>

<mosaic_0001>
module attributes {stable_mosaic.version = 11 : i64} {
  func.func @_geglu_kernel(%arg0: i32, %arg1: i32, %arg2: i32, %arg3: memref<16x32xf32, #tpu.memory_space<vmem>>, %arg4: memref<32x32xf32, #tpu.memory_space<vmem>>, %arg5: memref<32x32xf32, #tpu.memory_space<vmem>>, %arg6: memref<1x32xf32, #tpu.memory_space<vmem>>, %arg7: memref<1x32xf32, #tpu.memory_space<vmem>>, %arg8: memref<16x32xf32, #tpu.memory_space<vmem>>, %arg9: memref<16x32xf32, #tpu.memory_space<vmem>>, %arg10: memref<16x32xf32, #tpu.memory_space<vmem>>) attributes {dimension_semantics = [#tpu.dimension_semantics<parallel>, #tpu.dimension_semantics<parallel>, #tpu.dimension_semantics<arbitrary>], iteration_bounds = array<i64: 1, 1, 1>, scalar_prefetch = 0 : i64, scratch_operands = 2 : i64, tpu.core_type = #tpu.core_type<tc>, window_params = [{transform_indices = @transform_0, window_bounds = array<i64: 16, 32>}, {transform_indices = @transform_1, window_bounds = array<i64: 32, 32>}, {transform_indices = @transform_2, window_bounds = array<i64: 32, 32>}, {transform_indices = @transform_3, window_bounds = array<i64: 1, 32>}, {transform_indices = @transform_4, window_bounds = array<i64: 1, 32>}, {transform_indices = @transform_5, window_bounds = array<i64: 16, 32>}]} {
    %c0_i32 = arith.constant 0 : i32
    %0 = arith.cmpi eq, %arg2, %c0_i32 : i32
    %1 = arith.extui %0 : i1 to i32
    %c0_i32_0 = arith.constant 0 : i32
    %2 = arith.cmpi ne, %1, %c0_i32_0 : i32
    scf.if %2 {
      %cst_17 = arith.constant 0.000000e+00 : f32
      %17 = vector.broadcast %cst_17 : f32 to vector<16x32xf32>
      %c0_18 = arith.constant 0 : index
      %c0_19 = arith.constant 0 : index
      %18 = vector.load %arg9[%c0_18, %c0_19] : memref<16x32xf32, #tpu.memory_space<vmem>>, vector<16x32xf32>
      tpu.vector_store %arg9[%c0_18, %c0_19], %17 {strides = array<i32>} : memref<16x32xf32, #tpu.memory_space<vmem>>, vector<16x32xf32>,
      %cst_20 = arith.constant 0.000000e+00 : f32
      %19 = vector.broadcast %cst_20 : f32 to vector<16x32xf32>
      %c0_21 = arith.constant 0 : index
      %c0_22 = arith.constant 0 : index
      %20 = vector.load %arg10[%c0_21, %c0_22] : memref<16x32xf32, #tpu.memory_space<vmem>>, vector<16x32xf32>
      tpu.vector_store %arg10[%c0_21, %c0_22], %19 {strides = array<i32>} : memref<16x32xf32, #tpu.memory_space<vmem>>, vector<16x32xf32>,
    } else {
    }
    %c0 = arith.constant 0 : index
    %c0_1 = arith.constant 0 : index
    %3 = vector.load %arg3[%c0, %c0_1] : memref<16x32xf32, #tpu.memory_space<vmem>>, vector<16x32xf32>
    %c0_2 = arith.constant 0 : index
    %c0_3 = arith.constant 0 : index
    %4 = vector.load %arg9[%c0_2, %c0_3] : memref<16x32xf32, #tpu.memory_space<vmem>>, vector<16x32xf32>
    %c0_4 = arith.constant 0 : index
    %c0_5 = arith.constant 0 : index
    %5 = vector.load %arg4[%c0_4, %c0_5] : memref<32x32xf32, #tpu.memory_space<vmem>>, vector<32x32xf32>
    %cst = arith.constant dense<0.000000e+00> : vector<16x32xf32>
    %6 = tpu.matmul %3, %5, %cst {dimension_numbers = #tpu.dot_dimension_numbers<[1], [0], [0], [1], [0, 0, 1, 1], [], []>} : vector<16x32xf32>, vector<32x32xf32>, vector<16x32xf32> -> vector<16x32xf32>
    %7 = arith.addf %4, %6 : vector<16x32xf32>
    %c0_6 = arith.constant 0 : index
    %c0_7 = arith.constant 0 : index
    %8 = vector.load %arg9[%c0_6, %c0_7] : memref<16x32xf32, #tpu.memory_space<vmem>>, vector<16x32xf32>
    tpu.vector_store %arg9[%c0_6, %c0_7], %7 {strides = array<i32>} : memref<16x32xf32, #tpu.memory_space<vmem>>, vector<16x32xf32>,
    %c0_8 = arith.constant 0 : index
    %c0_9 = arith.constant 0 : index
    %9 = vector.load %arg10[%c0_8, %c0_9] : memref<16x32xf32, #tpu.memory_space<vmem>>, vector<16x32xf32>
    %c0_10 = arith.constant 0 : index
    %c0_11 = arith.constant 0 : index
    %10 = vector.load %arg5[%c0_10, %c0_11] : memref<32x32xf32, #tpu.memory_space<vmem>>, vector<32x32xf32>
    %cst_12 = arith.constant dense<0.000000e+00> : vector<16x32xf32>
    %11 = tpu.matmul %3, %10, %cst_12 {dimension_numbers = #tpu.dot_dimension_numbers<[1], [0], [0], [1], [0, 0, 1, 1], [], []>} : vector<16x32xf32>, vector<32x32xf32>, vector<16x32xf32> -> vector<16x32xf32>
    %12 = arith.addf %9, %11 : vector<16x32xf32>
    %c0_13 = arith.constant 0 : index
    %c0_14 = arith.constant 0 : index
    %13 = vector.load %arg10[%c0_13, %c0_14] : memref<16x32xf32, #tpu.memory_space<vmem>>, vector<16x32xf32>
    tpu.vector_store %arg10[%c0_13, %c0_14], %12 {strides = array<i32>} : memref<16x32xf32, #tpu.memory_space<vmem>>, vector<16x32xf32>,
    %c0_i32_15 = arith.constant 0 : i32
    %14 = arith.cmpi eq, %arg2, %c0_i32_15 : i32
    %15 = arith.extui %14 : i1 to i32
    %c0_i32_16 = arith.constant 0 : i32
    %16 = arith.cmpi ne, %15, %c0_i32_16 : i32
    scf.if %16 {
      %c0_17 = arith.constant 0 : index
      %c0_18 = arith.constant 0 : index
      %17 = vector.load %arg9[%c0_17, %c0_18] : memref<16x32xf32, #tpu.memory_space<vmem>>, vector<16x32xf32>
      %c0_19 = arith.constant 0 : index
      %c0_20 = arith.constant 0 : index
      %18 = vector.load %arg6[%c0_19, %c0_20] : memref<1x32xf32, #tpu.memory_space<vmem>>, vector<1x32xf32>
      %19 = vector.broadcast %18 : vector<1x32xf32> to vector<16x32xf32>
      %20 = arith.addf %17, %19 : vector<16x32xf32>
      %c0_21 = arith.constant 0 : index
      %c0_22 = arith.constant 0 : index
      %21 = vector.load %arg10[%c0_21, %c0_22] : memref<16x32xf32, #tpu.memory_space<vmem>>, vector<16x32xf32>
      %c0_23 = arith.constant 0 : index
      %c0_24 = arith.constant 0 : index
      %22 = vector.load %arg7[%c0_23, %c0_24] : memref<1x32xf32, #tpu.memory_space<vmem>>, vector<1x32xf32>
      %23 = vector.broadcast %22 : vector<1x32xf32> to vector<16x32xf32>
      %24 = arith.addf %21, %23 : vector<16x32xf32>
      %cst_25 = arith.constant 5.000000e-01 : f32
      %25 = vector.broadcast %cst_25 : f32 to vector<16x32xf32>
      %26 = arith.mulf %25, %24 : vector<16x32xf32>
      %cst_26 = arith.constant 0.707106769 : f32
      %27 = vector.broadcast %cst_26 : f32 to vector<16x32xf32>
      %28 = arith.mulf %24, %27 : vector<16x32xf32>
      %29 = math.erf %28 : vector<16x32xf32>
      %cst_27 = arith.constant 1.000000e+00 : f32
      %30 = vector.broadcast %cst_27 : f32 to vector<16x32xf32>
      %31 = arith.addf %30, %29 : vector<16x32xf32>
      %32 = arith.mulf %26, %31 : vector<16x32xf32>
      %33 = arith.mulf %20, %32 : vector<16x32xf32>
      %c0_28 = arith.constant 0 : index
      %c0_29 = arith.constant 0 : index
      %34 = vector.load %arg8[%c0_28, %c0_29] : memref<16x32xf32, #tpu.memory_space<vmem>>, vector<16x32xf32>
      tpu.vector_store %arg8[%c0_28, %c0_29], %33 {strides = array<i32>} : memref<16x32xf32, #tpu.memory_space<vmem>>, vector<16x32xf32>,
    } else {
    }
    return
  }
  func.func @transform_0(%arg0: i32, %arg1: i32, %arg2: i32) -> (i32, i32) {
    %c0_i32 = arith.constant 0 : i32
    return %arg1, %arg2 : i32, i32
  }
  func.func @transform_1(%arg0: i32, %arg1: i32, %arg2: i32) -> (i32, i32) {
    %c0_i32 = arith.constant 0 : i32
    return %arg2, %arg0 : i32, i32
  }
  func.func @transform_2(%arg0: i32, %arg1: i32, %arg2: i32) -> (i32, i32) {
    %c0_i32 = arith.constant 0 : i32
    %0 = arith.addi %arg0, %c0_i32 : i32
    %c0_i32_0 = arith.constant 0 : i32
    return %arg2, %0 : i32, i32
  }
  func.func @transform_3(%arg0: i32, %arg1: i32, %arg2: i32) -> (i32, i32) {
    %c0_i32 = arith.constant 0 : i32
    %c0_i32_0 = arith.constant 0 : i32
    return %c0_i32, %arg0 : i32, i32
  }
  func.func @transform_4(%arg0: i32, %arg1: i32, %arg2: i32) -> (i32, i32) {
    %c0_i32 = arith.constant 0 : i32
    %0 = arith.addi %arg0, %c0_i32 : i32
    %c0_i32_0 = arith.constant 0 : i32
    %c0_i32_1 = arith.constant 0 : i32
    return %c0_i32_0, %0 : i32, i32
  }
  func.func @transform_5(%arg0: i32, %arg1: i32, %arg2: i32) -> (i32, i32) {
    %c0_i32 = arith.constant 0 : i32
    return %arg1, %arg0 : i32, i32
  }
}

</mosaic_0001>

<bundles_post_ra>
// kernel: tpu_custom_call.1
= control target key start
LH: loop header
LB: loop body
LE: loop exit
PB: predicated region body
PF: predicated region fallthrough
CT: control target
= control target key end

     0   :  { %10 = vsyncpa [#allocation5], 0  ;;  %s506_s0 = inlined_call_operand.hbm [shape: f32[16,32], index: 0, kind: input, shape index: {}]   ;;  %s507_s1 = inlined_call_operand.hbm [shape: f32[32,32], index: 1, kind: input, shape index: {}]   ;;  %s508_s2 = inlined_call_operand.hbm [shape: f32[32,32], index: 2, kind: input, shape index: {}]   ;;  %s509_s3 = inlined_call_operand.vmem [shape: f32[1,32], index: 3, kind: input, shape index: {}]   ;;  %s510_s4 = inlined_call_operand.vmem [shape: f32[1,32], index: 4, kind: input, shape index: {}]   ;;  %s511_s5 = inlined_call_operand.hbm [shape: f32[16,32], index: 5, kind: output, shape index: {}]  }
   0x1   :  { %11 = vsyncpa [#allocation8], 0 }
   0x2   :  { %12 = vsyncpa [#allocation6], 0  ;;  %s30_s20 = sshll.u32 %s507_s1, 4  ;;  %s412_s21 = smov [#allocation7]   ;;  %s31_s20 = int_to_ptr.hbm [resolvable:$true] %s30_s20 }
   0x3   :  { %s32_s22 = sshll.u32 %s412_s21, 4  ;;  %s17_s25 = sshll.u32 %s506_s0, 4  ;;  %s33_s22 = int_to_ptr.vmem [resolvable:$true] %s32_s22  ;;  %s18_s25 = int_to_ptr.hbm [resolvable:$true] %s17_s25 }
   0x4   :  { %s413_s26 = smov 128   ;;  %s414_s27 = smov 8  }
   0x5   :  { %38 = dma.hbm_to_vmem [thread:$0]  %s31_s20, 512, %s33_s22, [#allocation8], %s413_s26, %s413_s26, %s414_s27  }
   0x6   :  { %s415_s28 = smov [#allocation4]   ;;  %s43_s1 = sshll.u32 %s508_s2, 4  ;;  %s44_s1 = int_to_ptr.hbm [resolvable:$true] %s43_s1 }
   0x7   :  { %s19_s29 = sshll.u32 %s415_s28, 4  ;;  %s416_s0 = smov [#allocation9]   ;;  %s20_s29 = int_to_ptr.vmem [resolvable:$true] %s19_s29 }
   0x8   :  { %25 = dma.hbm_to_vmem [thread:$0]  %s18_s25, 256, %s20_s29, [#allocation5], %s413_s26, %s413_s26, %s414_s27  }
   0x9   :  { %s45_s7 = sshll.u32 %s416_s0, 4  ;;  %s46_s7 = int_to_ptr.vmem [resolvable:$true] %s45_s7 }
   0xa   :  { %51 = dma.hbm_to_vmem [thread:$0]  %s44_s1, 512, %s46_s7, [#allocation8], %s413_s26, %s413_s26, %s414_s27  }
   0xb   :  { %406 = dma.done.wait [#allocation5], 256  }
   0xc   :  { %407 = vsyncadd [#allocation5], 4294967040 }
   0xd   :  { %408 = dma.done.wait [#allocation8], 1024  }
   0xe   :  { %409 = vsyncadd [#allocation8], 4294966272  ;;  %vm72_vm0 = vcmask 261120   ;;  %v417_v0 = vmov 0.0   ;;  %v124_v1 = vld [vmem:[#allocation9 + $0x18] sm:$0xff]  ;;  %v123_v2 = vld [vmem:[#allocation9 + $0x10] sm:$0xff] }
   0xf   :  { %75 = vst.msk [vmem:[#allocation3] sm:$0xff] %vm72_vm0, %v417_v0  ;;  %137 = vmatpush.msra.mxu1 %v124_v1  ;;  %293 = vmatpush.msra.mxu3 %v124_v1  ;;  %v122_v3 = vld [vmem:[#allocation9 + $0x8] sm:$0xff]  ;;  %v84_v4 = vld [vmem:[#allocation7 + $0x18] sm:$0xff]  ;;  %v83_v5 = vld [vmem:[#allocation7 + $0x10] sm:$0xff]  ;;  %s269_s13 = sshll.u32 %s511_s5, 4  ;;  %s270_s13 = int_to_ptr.hbm [resolvable:$true] %s269_s13 }
  0x10   :  { %73 = vst.msk [vmem:[#allocation2] sm:$0xff] %vm72_vm0, %v417_v0  ;;  %v121_v6 = vld [vmem:[#allocation9] sm:$0xff]  ;;  %104 = vmatpush.msra.mxu0 %v84_v4  ;;  %289 = vmatpush.msra.mxu2 %v84_v4  ;;  %v77_v7 = vld [vmem:[#allocation4] sm:$0xff]  ;;  %v78_v8 = vld [vmem:[#allocation4 + $0x8] sm:$0xff] }
  0x11   :  { %74 = vst.msk [vmem:[#allocation2 + $0x8] sm:$0xff] %vm72_vm0, %v417_v0  ;;  %138 = vmatpush.msra.mxu1 %v123_v2  ;;  %294 = vmatpush.msra.mxu3 %v123_v2  ;;  %v82_v9 = vld [vmem:[#allocation7 + $0x8] sm:$0xff]  ;;  %v81_v10 = vld [vmem:[#allocation7] sm:$0xff]  ;;  %v305_v20 = vld [vmem:[%s510_s4] ss:$0 sm:$0xff] }
  0x12   :  { %76 = vst.msk [vmem:[#allocation3 + $0x8] sm:$0xff] %vm72_vm0, %v417_v0  ;;  %105 = vmatpush.msra.mxu0 %v83_v5  ;;  %290 = vmatpush.msra.mxu2 %v83_v5 }
  0x13   :  { %139 = vmatpush.msra.mxu1 %v122_v3  ;;  %295 = vmatpush.msra.mxu3 %v122_v3 }
  0x14   :  { %106 = vmatpush.msra.mxu0 %v82_v9  ;;  %291 = vmatpush.msra.mxu2 %v82_v9 }
  0x15   :  { %140 = vmatpush.msra.mxu1 %v121_v6  ;;  %296 = vmatpush.msra.mxu3 %v121_v6 }
  0x16   :  { %285 = vmatmul.msk.f32.vlgmr.msra.gmra.mxu1 %vm72_vm0, %v77_v7  ;;  %286 = vmatmul.msk.f32.vlgmr.msra.gmra.mxu3 %vm72_vm0, %v78_v8  ;;  %v119_v11 = vld [vmem:[#allocation3] sm:$0xff] }
  0x17   :  { %107 = vmatpush.msra.mxu0 %v81_v10  ;;  %292 = vmatpush.msra.mxu2 %v81_v10  ;;  %v79_v14 = vld [vmem:[#allocation2] sm:$0xff] }
  0x18   :  { %283 = vmatmul.msk.f32.vlgmr.msra.gmra.mxu0 %vm72_vm0, %v77_v7  ;;  %284 = vmatmul.msk.f32.vlgmr.msra.gmra.mxu2 %vm72_vm0, %v78_v8  ;;  %v80_v21 = vld [vmem:[#allocation2 + $0x8] sm:$0xff] }
  0x19   :  { %v120_v15 = vld [vmem:[#allocation3 + $0x8] sm:$0xff] }
  0x93   :  { %v142_v12 = vpop.f32.mrf.mxu1 }
  0x94   :  { %v148_v13 = vadd.f32 %v142_v12, %v119_v11 }
  0x95   :  { %v109_v16 = vpop.f32.mrf.mxu0 }
  0x96   :  { %150 = vst.msk [vmem:[#allocation3] sm:$0xff] %vm72_vm0, %v148_v13  ;;  %v115_v17 = vadd.f32 %v109_v16, %v79_v14 }
  0x98   :  { %117 = vst.msk [vmem:[#allocation2] sm:$0xff] %vm72_vm0, %v115_v17 }
  0x99   :  { %v145_v18 = vpop.f32.mrf.mxu3 }
  0x9a   :  { %v149_v19 = vadd.f32 %v145_v18, %v120_v15 }
  0x9b   :  { %v112_v22 = vpop.f32.mrf.mxu2 }
  0x9c   :  { %151 = vst.msk [vmem:[#allocation3 + $0x8] sm:$0xff] %vm72_vm0, %v149_v19  ;;  %v116_v24 = vadd.f32 %v112_v22, %v80_v21 }
  0x9d   :  { %v163_v23 = vld [vmem:[#allocation3] sm:$0xff] }
  0x9e   :  { %v481_v25 = vadd.f32 %v305_v20, %v163_v23  ;;  %118 = vst.msk [vmem:[#allocation2 + $0x8] sm:$0xff] %vm72_vm0, %v116_v24 }
  0xa0   :  { %v173_v26 = vmul.f32 0.70710677, %v481_v25 }
  0xa2   :  { %v175_v27 = vmul.f32 %v173_v26, %v173_v26 }
  0xa3   :  { %v164_v28 = vld [vmem:[#allocation3 + $0x8] sm:$0xff] }
  0xa4   :  { %v485_v29 = vadd.f32 %v305_v20, %v164_v28  ;;  %v176_v30 = vmin.f32 %v175_v27, 16.0 }
  0xa6   :  { %v488_v31 = vmul.f32 0.70710677, %v485_v29  ;;  %v177_v32 = vmul.f32 2.1237322e-06, %v176_v30  ;;  %v188_v33 = vmul.f32 3.8918573e-05, %v176_v30 }
  0xa8   :  { %v178_v34 = vadd.f32 0.00028619796, %v177_v32  ;;  %v215_v35 = vmul.f32 %v488_v31, %v488_v31  ;;  %v189_v36 = vadd.f32 0.001143296, %v188_v33  ;;  %v155_v33 = vld [vmem:[#allocation2] sm:$0xff] }
  0xaa   :  { %v179_v37 = vmul.f32 %v178_v34, %v176_v30  ;;  %v216_v38 = vmin.f32 %v215_v35, 16.0  ;;  %v190_v39 = vmul.f32 %v189_v36, %v176_v30 }
  0xac   :  { %v217_v40 = vmul.f32 2.1237322e-06, %v216_v38  ;;  %v228_v41 = vmul.f32 3.8918573e-05, %v216_v38  ;;  %v180_v42 = vadd.f32 0.0036580483, %v179_v37 }
  0xad   :  { %v191_v43 = vadd.f32 0.014752088, %v190_v39  ;;  %v171_v39 = vmul.f32 0.5, %v481_v25 }
  0xae   :  { %v218_v44 = vadd.f32 0.00028619796, %v217_v40  ;;  %v229_v45 = vadd.f32 0.001143296, %v228_v41  ;;  %v181_v49 = vmul.f32 %v180_v42, %v176_v30 }
  0xaf   :  { %v192_v46 = vmul.f32 %v191_v43, %v176_v30  ;;  %v156_v43 = vld [vmem:[#allocation2 + $0x8] sm:$0xff] }
  0xb0   :  { %v219_v47 = vmul.f32 %v218_v44, %v216_v38  ;;  %v230_v48 = vmul.f32 %v229_v45, %v216_v38  ;;  %v182_v55 = vadd.f32 0.05243302, %v181_v49 }
  0xb1   :  { %v193_v50 = vadd.f32 0.112945676, %v192_v46 }
  0xb2   :  { %v220_v51 = vadd.f32 0.0036580483, %v219_v47  ;;  %v231_v52 = vadd.f32 0.014752088, %v230_v48  ;;  %v183_v61 = vmul.f32 %v182_v55, %v176_v30  ;;  %v172_v48 = vmul.f32 0.5, %v485_v29 }
  0xb3   :  { %v194_v53 = vmul.f32 %v193_v50, %v176_v30 }
  0xb4   :  { %v232_v54 = vmul.f32 %v231_v52, %v216_v38  ;;  %v221_v57 = vmul.f32 %v220_v51, %v216_v38  ;;  %v184_v2 = vadd.f32 0.18741608, %v183_v61 }
  0xb5   :  { %v195_v56 = vadd.f32 0.4994258, %v194_v53 }
  0xb6   :  { %v233_v58 = vadd.f32 0.112945676, %v232_v54  ;;  %v222_v63 = vadd.f32 0.05243302, %v221_v57  ;;  %v185_v6 = vmul.f32 %v184_v2, %v176_v30 }
  0xb7   :  { %v196_v59 = vmul.f32 %v195_v56, %v176_v30  ;;  %v304_v30 = vld [vmem:[%s509_s3] ss:$0 sm:$0xff]  ;;  %s418_s3 = smov [#allocation10]  }
  0xb8   :  { %v234_v60 = vmul.f32 %v233_v58, %v216_v38  ;;  %v223_v3 = vmul.f32 %v222_v63, %v216_v38  ;;  %v186_v10 = vadd.f32 1.1283791, %v185_v6  ;;  %v162_v47 = vadd.f32 %v304_v30, %v156_v43  ;;  %s267_s10 = sshll.u32 %s418_s3, 4  ;;  %s268_s10 = int_to_ptr.vmem [resolvable:$true] %s267_s10 }
  0xb9   :  { %v197_v62 = vadd.f32 1.0, %v196_v59 }
  0xba   :  { %v235_v0 = vadd.f32 0.4994258, %v234_v60  ;;  %v224_v8 = vadd.f32 0.18741608, %v223_v3  ;;  %v187_v18 = vmul.f32 %v186_v10, %v173_v26 }
  0xbb   :  { %306 = vrcp.f32 %v197_v62  ;;  %v209_v11 = vand.u32 2147483648, %v197_v62  ;;  %v207_v14 = vand.u32 2147483647, %v197_v62  ;;  %vm203_vm2 = vweird.f32 %v197_v62 }
  0xbc   :  { %v236_v1 = vmul.f32 %v235_v0, %v216_v38  ;;  %v225_v15 = vmul.f32 %v224_v8, %v216_v38  ;;  %v161_v38 = vadd.f32 %v304_v30, %v155_v33 }
  0xbd   :  { %v210_v19 = vor.u32 1.1754944e-38, %v209_v11  ;;  %vm208_vm4 = vcmp.eq.f32.partialorder %v207_v14, 8.507059e+37 }
  0xbe   :  { %v237_v4 = vadd.f32 1.0, %v236_v1  ;;  %v226_v22 = vadd.f32 1.1283791, %v225_v15 }
  0xc0   :  { %308 = vrcp.f32 %v237_v4  ;;  %v249_v23 = vand.u32 2147483648, %v237_v4  ;;  %v247_v28 = vand.u32 2147483647, %v237_v4  ;;  %vm243_vm6 = vweird.f32 %v237_v4 }
  0xc1   :  { %v307_v5 = vpop.eup %306  ;;  %v227_v36 = vmul.f32 %v226_v22, %v488_v31 }
  0xc2   :  { %v199_v7 = vmul.f32 %v307_v5, %v197_v62  ;;  %vm204_vm1 = vweird.f32 %v307_v5  ;;  %v250_v35 = vor.u32 1.1754944e-38, %v249_v23  ;;  %vm248_vm8 = vcmp.eq.f32.partialorder %v247_v28, 8.507059e+37 }
  0xc3   :  { %vm205_vm3 = vmor %vm203_vm2, %vm204_vm1 }
  0xc4   :  { %v200_v9 = vsub.f32 1.0, %v199_v7 }
  0xc6   :  { %v309_v12 = vpop.eup %308  ;;  %v201_v13 = vmul.f32 %v307_v5, %v200_v9 }
  0xc7   :  { %v239_v16 = vmul.f32 %v309_v12, %v237_v4  ;;  %vm244_vm5 = vweird.f32 %v309_v12 }
  0xc8   :  { %v202_v17 = vadd.f32 %v307_v5, %v201_v13  ;;  %vm245_vm7 = vmor %vm243_vm6, %vm244_vm5 }
  0xc9   :  { %v240_v20 = vsub.f32 1.0, %v239_v16 }
  0xca   :  { %v206_v21 = vsel %vm205_vm3, %v307_v5, %v202_v17 }
  0xcb   :  { %v211_v24 = vsel %vm208_vm4, %v210_v19, %v206_v21  ;;  %v241_v27 = vmul.f32 %v309_v12, %v240_v20 }
  0xcc   :  { %v212_v32 = vmul.f32 %v211_v24, %v187_v18 }
  0xcd   :  { %v242_v34 = vadd.f32 %v309_v12, %v241_v27 }
  0xce   :  { %v287_v26 = vclamps-f32 %v212_v32, 1.0 }
  0xcf   :  { %v246_v37 = vsel %vm245_vm7, %v309_v12, %v242_v34 }
  0xd0   :  { %v251_v40 = vsel %vm248_vm8, %v250_v35, %v246_v37  ;;  %v255_v41 = vadd.f32 1.0, %v287_v26 }
  0xd1   :  { %v252_v42 = vmul.f32 %v251_v40, %v227_v36 }
  0xd2   :  { %v257_v44 = vmul.f32 %v255_v41, %v171_v39 }
  0xd3   :  { %v288_v45 = vclamps-f32 %v252_v42, 1.0 }
  0xd4   :  { %v259_v46 = vmul.f32 %v257_v44, %v161_v38 }
  0xd5   :  { %v256_v49 = vadd.f32 1.0, %v288_v45 }
  0xd6   :  { %261 = vst.msk [vmem:[#allocation10] sm:$0xff] %vm72_vm0, %v259_v46 }
  0xd7   :  { %v258_v25 = vmul.f32 %v256_v49, %v172_v48 }
  0xd9   :  { %v260_v31 = vmul.f32 %v258_v25, %v162_v47 }
  0xdb   :  { %262 = vst.msk [vmem:[#allocation10 + $0x8] sm:$0xff] %vm72_vm0, %v260_v31 }
  0xdc   :  { %275 = dma.vmem_to_hbm [thread:$0]  %s268_s10, 256, %s270_s13, [#allocation6], %s413_s26, %s413_s26, %s414_s27  }
  0xdd   :  { %410 = dma.done.wait [#allocation6], 256  }
  0xde   :  { %411 = vsyncadd [#allocation6], 4294967040 }
  0xdf   :  { %280 = vsyncpa [#allocation5], 1 }
  0xe0   :  { %281 = vsyncpa [#allocation8], 1 }
  0xe1   :  { %282 = vsyncpa [#allocation6], 1 }

</bundles_post_ra>
